<compile_context>
chip_gen: v5e
topology: v5e:2x2
jax: 0.10.0
libtpu: 0.0.40
codegen_flags: <defaults>
</compile_context>

<pallas_src>
import functools

import jax
import jax.numpy as jnp
from jax.experimental import pallas as pl
from jax.experimental.pallas import tpu as pltpu


def _koopman_loss_kernel(x_ref, xrec_ref, xpred_ref, y_ref,
                         xek_ref, yenc_ref, xpe_ref, o_ref, *,
                         w_recon, w_pred, w_lin, w_noise, accumulate):
    """One grid step = `tb` batch samples.

    x/xrec/xpred/y_ref : VMEM (tb*C, H*W)  lane-dense image slabs
    xek/yenc/xpe_ref   : VMEM (tb, D)      encoded vectors
    o_ref              : VMEM (8, 128)     per-core partial sum (broadcast
                                           scalar), resident across the
                                           reduction ("arbitrary") grid axis.
    w_* are compile-time Python floats: a1/(B*C), a2/(B*C), a3/B, a4/B.
    """

    def frob_sum(a, b):
        # sum over rows of sqrt(sum over HW of (a-b)^2); subtract in the
        # native dtype (bf16 VALU on v6e/v7x), widen to f32 for square/acc.
        d = (a - b).astype(jnp.float32)
        ss = jnp.sum(d * d, axis=1, keepdims=True)          # (tb*C, 1)
        return jnp.sum(jnp.sqrt(ss), keepdims=True)         # (1, 1)

    def l1_sum(a, b):
        # sum over all elements of |a-b|; abs in native dtype, f32 accumulate.
        return jnp.sum(jnp.abs(a - b).astype(jnp.float32), keepdims=True)

    yenc = yenc_ref[...]                                     # loaded once, reused
    tile = (w_recon * frob_sum(x_ref[...], xrec_ref[...])    # a1*mse(x, x_recon)
            + w_pred * frob_sum(xpred_ref[...], y_ref[...])  # a2*mse(x_pred, y)
            + w_lin * l1_sum(xek_ref[...], yenc)             # a3*mae(x_enc_k, y_enc)
            + w_noise * l1_sum(xpe_ref[...], yenc))          # a4*mae(x_pred_enc, y_enc)

    if accumulate:
        @pl.when(pl.program_id(1) == 0)
        def _init():
            o_ref[...] = jnp.zeros_like(o_ref)
        o_ref[...] += tile                                   # broadcast (1,1)->(8,128)
    else:
        o_ref[...] = jnp.broadcast_to(tile, o_ref.shape)


def make_koopman_vit_loss(a1, a2, a3, a4, *, max_block_bytes=8 << 20):
    """Functional equivalent of KoopmanViTLoss(a1, a2, a3, a4).forward.

    max_block_bytes: conservative cap on the double-buffered per-step input
    footprint; 8 MiB fits comfortably under the default scoped-VMEM limits of
    v5e (16 MiB), v6e (32 MiB) and v7x (32 MiB of 64 MiB physical).
    """

    def loss_fn(x, y, x_predicted, y_encoded, x_predicted_encoded,
                x_encoded_koopman, x_recon):
        B, C, H, W = x.shape
        D = y_encoded.shape[-1]
        hw = H * W

        # ---- adaptive batch tile -------------------------------------------
        img_item = jnp.dtype(x.dtype).itemsize
        enc_item = jnp.dtype(y_encoded.dtype).itemsize
        per_sample = 2 * (4 * C * hw * img_item + 3 * D * enc_item)  # x2: dbl buf
        tb_cap = max(8, (max_block_bytes // per_sample) // 8 * 8)

        if B <= tb_cap:
            tb = B                      # whole batch in one step
        elif B % 8 == 0:
            tb = 8
            cand = tb_cap
            while cand >= 8:            # largest multiple of 8 dividing B
                if B % cand == 0:
                    tb = cand
                    break
                cand -= 8
        else:
            # TODO(synk): mask/pad ragged batches instead of taking the whole
            # batch in one block (can exceed VMEM for very large odd B).
            tb = B

        num_steps = B // tb
        # Split the reduction across 2 TensorCores (v7x) when cleanly possible.
        P = 2 if (num_steps >= 2 and num_steps % 2 == 0) else 1
        S = num_steps // P

        # ---- lane-dense layout: (B, C, H, W) -> (B*C, H*W) (free reshape) ---
        x2 = x.reshape(B * C, hw)
        y2 = y.reshape(B * C, hw)
        xp2 = x_predicted.reshape(B * C, hw)
        xr2 = x_recon.reshape(B * C, hw)

        img_spec = pl.BlockSpec((tb * C, hw), lambda p, j, S=S: (p * S + j, 0))
        enc_spec = pl.BlockSpec((tb, D), lambda p, j, S=S: (p * S + j, 0))
        out_spec = pl.BlockSpec((8, 128), lambda p, j: (p, 0))

        kernel = functools.partial(
            _koopman_loss_kernel,
            w_recon=float(a1) / (B * C),
            w_pred=float(a2) / (B * C),
            w_lin=float(a3) / B,
            w_noise=float(a4) / B,
            accumulate=(S > 1),
        )

        out = pl.pallas_call(
            kernel,
            out_shape=jax.ShapeDtypeStruct((8 * P, 128), jnp.float32),
            grid_spec=pltpu.PrefetchScalarGridSpec(
                num_scalar_prefetch=0,
                grid=(P, S),
                in_specs=[
                    img_spec,   # x
                    img_spec,   # x_recon
                    img_spec,   # x_predicted
                    img_spec,   # y
                    enc_spec,   # x_encoded_koopman
                    enc_spec,   # y_encoded
                    enc_spec,   # x_predicted_encoded
                ],
                out_specs=out_spec,
            ),
            compiler_params=pltpu.CompilerParams(
                dimension_semantics=("parallel", "arbitrary"),
            ),
        )(x2, xr2, xp2, y2,
          x_encoded_koopman, y_encoded, x_predicted_encoded)

        # Each per-core (8,128) block holds its partial sum broadcast; take
        # one representative element per core and sum.
        return jnp.sum(out[0::8, 0])

    return loss_fn


if __name__ == "__main__":
    # Small shapes consistent with the module's forward signature:
    #   image tensors (B, C, H, W), encoded tensors (B, D).
    # The seven inputs are normally produced by the upstream KoopmanViT
    # network (outside this loss module's forward); deterministic random
    # stand-ins are used here.
    a1, a2, a3, a4 = 1.0, 0.5, 0.25, 0.125

    def mse_ref(p, q):
        return jnp.mean(jnp.mean(
            jnp.sqrt(jnp.sum((p - q) ** 2, axis=(2, 3))), axis=1))

    def mae_ref(p, q):
        return jnp.mean(jnp.sum(jnp.abs(p - q), axis=1))

    def make_inputs(key, B, C, H, W, D):
        ks = jax.random.split(key, 7)
        return dict(
            x=jax.random.normal(ks[0], (B, C, H, W), jnp.float32),
            y=jax.random.normal(ks[1], (B, C, H, W), jnp.float32),
            x_predicted=jax.random.normal(ks[2], (B, C, H, W), jnp.float32),
            x_recon=jax.random.normal(ks[3], (B, C, H, W), jnp.float32),
            y_encoded=jax.random.normal(ks[4], (B, D), jnp.float32),
            x_predicted_encoded=jax.random.normal(ks[5], (B, D), jnp.float32),
            x_encoded_koopman=jax.random.normal(ks[6], (B, D), jnp.float32),
        )

    def run_and_check(inputs, max_block_bytes):
        loss_fn = jax.jit(make_koopman_vit_loss(
            a1, a2, a3, a4, max_block_bytes=max_block_bytes))
        loss = jax.block_until_ready(loss_fn(
            inputs["x"], inputs["y"], inputs["x_predicted"],
            inputs["y_encoded"], inputs["x_predicted_encoded"],
            inputs["x_encoded_koopman"], inputs["x_recon"]))
        ref = (a1 * mse_ref(inputs["x"], inputs["x_recon"])
               + a2 * mse_ref(inputs["x_predicted"], inputs["y"])
               + a3 * mae_ref(inputs["x_encoded_koopman"], inputs["y_encoded"])
               + a4 * mae_ref(inputs["x_predicted_encoded"], inputs["y_encoded"]))
        assert loss.shape == ()
        assert bool(jnp.isfinite(loss))
        assert bool(jnp.allclose(loss, ref, rtol=1e-4, atol=1e-4)), (loss, ref)

    key = jax.random.PRNGKey(0)
    k1, k2 = jax.random.split(key)

    # Case 1: small batch -> whole batch in a single grid step (no accumulate).
    run_and_check(make_inputs(k1, B=16, C=3, H=32, W=32, D=256),
                  max_block_bytes=8 << 20)

    # Case 2: larger batch with a tight block budget -> tb=16, 4 reduction
    # steps split across a size-2 parallel axis (exercises accumulate path
    # and per-core partial sums).
    run_and_check(make_inputs(k2, B=64, C=3, H=32, W=32, D=256),
                  max_block_bytes=2 << 20)

    print("KERNEL_OK")
</pallas_src>

<mosaic_0001>
module attributes {stable_mosaic.version = 11 : i64} {
  func.func @_koopman_loss_kernel(%arg0: i32, %arg1: i32, %arg2: memref<48x1024xf32, #tpu.memory_space<vmem>>, %arg3: memref<48x1024xf32, #tpu.memory_space<vmem>>, %arg4: memref<48x1024xf32, #tpu.memory_space<vmem>>, %arg5: memref<48x1024xf32, #tpu.memory_space<vmem>>, %arg6: memref<16x256xf32, #tpu.memory_space<vmem>>, %arg7: memref<16x256xf32, #tpu.memory_space<vmem>>, %arg8: memref<16x256xf32, #tpu.memory_space<vmem>>, %arg9: memref<8x128xf32, #tpu.memory_space<vmem>>) attributes {dimension_semantics = [#tpu.dimension_semantics<parallel>, #tpu.dimension_semantics<arbitrary>], iteration_bounds = array<i64: 1, 1>, scalar_prefetch = 0 : i64, scratch_operands = 0 : i64, tpu.core_type = #tpu.core_type<tc>, window_params = [{transform_indices = @transform_0, window_bounds = array<i64: 48, 1024>}, {transform_indices = @transform_1, window_bounds = array<i64: 48, 1024>}, {transform_indices = @transform_2, window_bounds = array<i64: 48, 1024>}, {transform_indices = @transform_3, window_bounds = array<i64: 48, 1024>}, {transform_indices = @transform_4, window_bounds = array<i64: 16, 256>}, {transform_indices = @transform_5, window_bounds = array<i64: 16, 256>}, {transform_indices = @transform_6, window_bounds = array<i64: 16, 256>}, {transform_indices = @transform_7, window_bounds = array<i64: 8, 128>}]} {
    %c0 = arith.constant 0 : index
    %c0_0 = arith.constant 0 : index
    %0 = vector.load %arg7[%c0, %c0_0] : memref<16x256xf32, #tpu.memory_space<vmem>>, vector<16x256xf32>
    %c0_1 = arith.constant 0 : index
    %c0_2 = arith.constant 0 : index
    %1 = vector.load %arg2[%c0_1, %c0_2] : memref<48x1024xf32, #tpu.memory_space<vmem>>, vector<48x1024xf32>
    %c0_3 = arith.constant 0 : index
    %c0_4 = arith.constant 0 : index
    %2 = vector.load %arg3[%c0_3, %c0_4] : memref<48x1024xf32, #tpu.memory_space<vmem>>, vector<48x1024xf32>
    %3 = arith.subf %1, %2 : vector<48x1024xf32>
    %4 = arith.mulf %3, %3 : vector<48x1024xf32>
    %cst = arith.constant dense<0.000000e+00> : vector<48xf32>
    %5 = vector.multi_reduction <add>, %4, %cst [1] : vector<48x1024xf32> to vector<48xf32>
    %6 = vector.shape_cast %5 : vector<48xf32> to vector<48x1xf32>
    %7 = math.sqrt %6 : vector<48x1xf32>
    %8 = vector.shape_cast %7 : vector<48x1xf32> to vector<1x48x1xf32>
    %cst_5 = arith.constant dense<0.000000e+00> : vector<1xf32>
    %9 = vector.multi_reduction <add>, %8, %cst_5 [1, 2] : vector<1x48x1xf32> to vector<1xf32>
    %10 = vector.shape_cast %9 : vector<1xf32> to vector<1x1x1xf32>
    %11 = vector.extract %10[0, 0, 0] : f32 from vector<1x1x1xf32>
    %12 = vector.broadcast %11 : f32 to vector<1x1xf32>
    %cst_6 = arith.constant 0.020833334 : f32
    %13 = vector.broadcast %cst_6 : f32 to vector<1x1xf32>
    %14 = arith.mulf %13, %12 : vector<1x1xf32>
    %c0_7 = arith.constant 0 : index
    %c0_8 = arith.constant 0 : index
    %15 = vector.load %arg4[%c0_7, %c0_8] : memref<48x1024xf32, #tpu.memory_space<vmem>>, vector<48x1024xf32>
    %c0_9 = arith.constant 0 : index
    %c0_10 = arith.constant 0 : index
    %16 = vector.load %arg5[%c0_9, %c0_10] : memref<48x1024xf32, #tpu.memory_space<vmem>>, vector<48x1024xf32>
    %17 = arith.subf %15, %16 : vector<48x1024xf32>
    %18 = arith.mulf %17, %17 : vector<48x1024xf32>
    %cst_11 = arith.constant dense<0.000000e+00> : vector<48xf32>
    %19 = vector.multi_reduction <add>, %18, %cst_11 [1] : vector<48x1024xf32> to vector<48xf32>
    %20 = vector.shape_cast %19 : vector<48xf32> to vector<48x1xf32>
    %21 = math.sqrt %20 : vector<48x1xf32>
    %22 = vector.shape_cast %21 : vector<48x1xf32> to vector<1x48x1xf32>
    %cst_12 = arith.constant dense<0.000000e+00> : vector<1xf32>
    %23 = vector.multi_reduction <add>, %22, %cst_12 [1, 2] : vector<1x48x1xf32> to vector<1xf32>
    %24 = vector.shape_cast %23 : vector<1xf32> to vector<1x1x1xf32>
    %25 = vector.extract %24[0, 0, 0] : f32 from vector<1x1x1xf32>
    %26 = vector.broadcast %25 : f32 to vector<1x1xf32>
    %cst_13 = arith.constant 0.010416667 : f32
    %27 = vector.broadcast %cst_13 : f32 to vector<1x1xf32>
    %28 = arith.mulf %27, %26 : vector<1x1xf32>
    %29 = arith.addf %14, %28 : vector<1x1xf32>
    %c0_14 = arith.constant 0 : index
    %c0_15 = arith.constant 0 : index
    %30 = vector.load %arg6[%c0_14, %c0_15] : memref<16x256xf32, #tpu.memory_space<vmem>>, vector<16x256xf32>
    %31 = arith.subf %30, %0 : vector<16x256xf32>
    %32 = math.absf %31 : vector<16x256xf32>
    %33 = vector.shape_cast %32 : vector<16x256xf32> to vector<1x16x256xf32>
    %cst_16 = arith.constant dense<0.000000e+00> : vector<1xf32>
    %34 = vector.multi_reduction <add>, %33, %cst_16 [1, 2] : vector<1x16x256xf32> to vector<1xf32>
    %35 = vector.shape_cast %34 : vector<1xf32> to vector<1x1x1xf32>
    %36 = vector.extract %35[0, 0, 0] : f32 from vector<1x1x1xf32>
    %37 = vector.broadcast %36 : f32 to vector<1x1xf32>
    %cst_17 = arith.constant 1.562500e-02 : f32
    %38 = vector.broadcast %cst_17 : f32 to vector<1x1xf32>
    %39 = arith.mulf %38, %37 : vector<1x1xf32>
    %40 = arith.addf %29, %39 : vector<1x1xf32>
    %c0_18 = arith.constant 0 : index
    %c0_19 = arith.constant 0 : index
    %41 = vector.load %arg8[%c0_18, %c0_19] : memref<16x256xf32, #tpu.memory_space<vmem>>, vector<16x256xf32>
    %42 = arith.subf %41, %0 : vector<16x256xf32>
    %43 = math.absf %42 : vector<16x256xf32>
    %44 = vector.shape_cast %43 : vector<16x256xf32> to vector<1x16x256xf32>
    %cst_20 = arith.constant dense<0.000000e+00> : vector<1xf32>
    %45 = vector.multi_reduction <add>, %44, %cst_20 [1, 2] : vector<1x16x256xf32> to vector<1xf32>
    %46 = vector.shape_cast %45 : vector<1xf32> to vector<1x1x1xf32>
    %47 = vector.extract %46[0, 0, 0] : f32 from vector<1x1x1xf32>
    %48 = vector.broadcast %47 : f32 to vector<1x1xf32>
    %cst_21 = arith.constant 7.812500e-03 : f32
    %49 = vector.broadcast %cst_21 : f32 to vector<1x1xf32>
    %50 = arith.mulf %49, %48 : vector<1x1xf32>
    %51 = arith.addf %40, %50 : vector<1x1xf32>
    %52 = vector.shape_cast %51 : vector<1x1xf32> to vector<1x1xf32>
    %53 = vector.broadcast %52 : vector<1x1xf32> to vector<8x128xf32>
    %c0_22 = arith.constant 0 : index
    %c0_23 = arith.constant 0 : index
    %54 = vector.load %arg9[%c0_22, %c0_23] : memref<8x128xf32, #tpu.memory_space<vmem>>, vector<8x128xf32>
    tpu.vector_store %arg9[%c0_22, %c0_23], %53 {strides = array<i32>} : memref<8x128xf32, #tpu.memory_space<vmem>>, vector<8x128xf32>,
    return
  }
  func.func @transform_0(%arg0: i32, %arg1: i32) -> (i32, i32) {
    %c1_i32 = arith.constant 1 : i32
    %0 = arith.muli %arg0, %c1_i32 : i32
    %1 = arith.addi %0, %arg1 : i32
    %c0_i32 = arith.constant 0 : i32
    %c0_i32_0 = arith.constant 0 : i32
    return %1, %c0_i32 : i32, i32
  }
  func.func @transform_1(%arg0: i32, %arg1: i32) -> (i32, i32) {
    %c1_i32 = arith.constant 1 : i32
    %0 = arith.muli %arg0, %c1_i32 : i32
    %1 = arith.addi %0, %arg1 : i32
    %c0_i32 = arith.constant 0 : i32
    %c0_i32_0 = arith.constant 0 : i32
    return %1, %c0_i32 : i32, i32
  }
  func.func @transform_2(%arg0: i32, %arg1: i32) -> (i32, i32) {
    %c1_i32 = arith.constant 1 : i32
    %0 = arith.muli %arg0, %c1_i32 : i32
    %1 = arith.addi %0, %arg1 : i32
    %c0_i32 = arith.constant 0 : i32
    %c0_i32_0 = arith.constant 0 : i32
    return %1, %c0_i32 : i32, i32
  }
  func.func @transform_3(%arg0: i32, %arg1: i32) -> (i32, i32) {
    %c1_i32 = arith.constant 1 : i32
    %0 = arith.muli %arg0, %c1_i32 : i32
    %1 = arith.addi %0, %arg1 : i32
    %c0_i32 = arith.constant 0 : i32
    %c0_i32_0 = arith.constant 0 : i32
    return %1, %c0_i32 : i32, i32
  }
  func.func @transform_4(%arg0: i32, %arg1: i32) -> (i32, i32) {
    %c1_i32 = arith.constant 1 : i32
    %0 = arith.muli %arg0, %c1_i32 : i32
    %1 = arith.addi %0, %arg1 : i32
    %c0_i32 = arith.constant 0 : i32
    %c0_i32_0 = arith.constant 0 : i32
    return %1, %c0_i32 : i32, i32
  }
  func.func @transform_5(%arg0: i32, %arg1: i32) -> (i32, i32) {
    %c1_i32 = arith.constant 1 : i32
    %0 = arith.muli %arg0, %c1_i32 : i32
    %1 = arith.addi %0, %arg1 : i32
    %c0_i32 = arith.constant 0 : i32
    %c0_i32_0 = arith.constant 0 : i32
    return %1, %c0_i32 : i32, i32
  }
  func.func @transform_6(%arg0: i32, %arg1: i32) -> (i32, i32) {
    %c1_i32 = arith.constant 1 : i32
    %0 = arith.muli %arg0, %c1_i32 : i32
    %1 = arith.addi %0, %arg1 : i32
    %c0_i32 = arith.constant 0 : i32
    %c0_i32_0 = arith.constant 0 : i32
    return %1, %c0_i32 : i32, i32
  }
  func.func @transform_7(%arg0: i32, %arg1: i32) -> (i32, i32) {
    %c0_i32 = arith.constant 0 : i32
    %c0_i32_0 = arith.constant 0 : i32
    return %arg0, %c0_i32 : i32, i32
  }
}

</mosaic_0001>

<bundles_post_ra>
// kernel: loss_fn.1
= control target key start
LH: loop header
LB: loop body
LE: loop exit
PB: predicated region body
PF: predicated region fallthrough
CT: control target
= control target key end

     0   :  { %vm523_vm8 = vcmask 7168   ;;  %s1864_s2 = inlined_call_operand.vmem [shape: f32[48,1024], index: 2, kind: input, shape index: {}]   ;;  %s1865_s3 = inlined_call_operand.vmem [shape: f32[48,1024], index: 3, kind: input, shape index: {}]   ;;  %s1866_s0 = inlined_call_operand.vmem [shape: f32[48,1024], index: 0, kind: input, shape index: {}]   ;;  %s1867_s1 = inlined_call_operand.vmem [shape: f32[48,1024], index: 1, kind: input, shape index: {}]   ;;  %s1868_s5 = inlined_call_operand.vmem [shape: f32[16,256], index: 5, kind: input, shape index: {}]   ;;  %s1869_s4 = inlined_call_operand.vmem [shape: f32[16,256], index: 4, kind: input, shape index: {}]   ;;  %s1870_s6 = inlined_call_operand.vmem [shape: f32[16,256], index: 6, kind: input, shape index: {}]   ;;  %s1871_s7 = inlined_call_operand.vmem [shape: f32[8,128], index: 7, kind: output, shape index: {}]  }
   0x1   :  { %v546_v0 = vld [vmem:[%s1864_s2] sm:$0xff]  ;;  %v547_v1 = vld [vmem:[%s1864_s2 + $0x8] sm:$0xff]  ;;  %v548_v2 = vld [vmem:[%s1864_s2 + $0x10] sm:$0xff] }
   0x2   :  { %v549_v3 = vld [vmem:[%s1864_s2 + $0x18] sm:$0xff]  ;;  %v550_v4 = vld [vmem:[%s1864_s2 + $0x20] sm:$0xff]  ;;  %v551_v5 = vld [vmem:[%s1864_s2 + $0x28] sm:$0xff] }
   0x3   :  { %v552_v6 = vld [vmem:[%s1864_s2 + $0x30] sm:$0xff]  ;;  %v594_v7 = vld [vmem:[%s1865_s3] sm:$0xff]  ;;  %v553_v8 = vld [vmem:[%s1864_s2 + $0x38] sm:$0xff] }
   0x4   :  { %v595_v9 = vld [vmem:[%s1865_s3 + $0x8] sm:$0xff]  ;;  %v596_v10 = vld [vmem:[%s1865_s3 + $0x10] sm:$0xff]  ;;  %v597_v11 = vld [vmem:[%s1865_s3 + $0x18] sm:$0xff]  ;;  %v642_v12 = vsub.f32 %v546_v0, %v594_v7 }
   0x5   :  { %v598_v13 = vld [vmem:[%s1865_s3 + $0x20] sm:$0xff]  ;;  %v599_v14 = vld [vmem:[%s1865_s3 + $0x28] sm:$0xff]  ;;  %v600_v15 = vld [vmem:[%s1865_s3 + $0x30] sm:$0xff]  ;;  %v643_v16 = vsub.f32 %v547_v1, %v595_v9  ;;  %v644_v17 = vsub.f32 %v548_v2, %v596_v10  ;;  %v645_v18 = vsub.f32 %v549_v3, %v597_v11 }
   0x6   :  { %v601_v19 = vld [vmem:[%s1865_s3 + $0x38] sm:$0xff]  ;;  %v646_v20 = vsub.f32 %v550_v4, %v598_v13  ;;  %v690_v21 = vmul.f32 %v642_v12, %v642_v12  ;;  %v221_v22 = vld [vmem:[%s1866_s0 + $0x80] sm:$0xff]  ;;  %v222_v23 = vld [vmem:[%s1866_s0 + $0x88] sm:$0xff]  ;;  %v647_v29 = vsub.f32 %v551_v5, %v599_v14  ;;  %v648_v30 = vsub.f32 %v552_v6, %v600_v15 }
   0x7   :  { %v691_v24 = vmul.f32 %v643_v16, %v643_v16  ;;  %v692_v25 = vmul.f32 %v644_v17, %v644_v17  ;;  %v223_v26 = vld [vmem:[%s1866_s0 + $0x90] sm:$0xff]  ;;  %v224_v27 = vld [vmem:[%s1866_s0 + $0x98] sm:$0xff]  ;;  %v225_v28 = vld [vmem:[%s1866_s0 + $0xa0] sm:$0xff]  ;;  %v649_v34 = vsub.f32 %v553_v8, %v601_v19  ;;  %v693_v35 = vmul.f32 %v645_v18, %v645_v18 }
   0x8   :  { %v226_v31 = vld [vmem:[%s1866_s0 + $0xa8] sm:$0xff]  ;;  %v227_v32 = vld [vmem:[%s1866_s0 + $0xb0] sm:$0xff]  ;;  %v228_v33 = vld [vmem:[%s1866_s0 + $0xb8] sm:$0xff]  ;;  %v694_v40 = vmul.f32 %v646_v20, %v646_v20  ;;  %v695_v53 = vmul.f32 %v647_v29, %v647_v29  ;;  %v696_v54 = vmul.f32 %v648_v30, %v648_v30 }
   0x9   :  { %v738_v36 = vadd.f32 %v691_v24, %v690_v21  ;;  %v269_v37 = vld [vmem:[%s1867_s1 + $0x80] sm:$0xff]  ;;  %v270_v38 = vld [vmem:[%s1867_s1 + $0x88] sm:$0xff]  ;;  %v271_v39 = vld [vmem:[%s1867_s1 + $0x90] sm:$0xff]  ;;  %v697_v3 = vmul.f32 %v649_v34, %v649_v34 }
   0xa   :  { %v272_v41 = vld [vmem:[%s1867_s1 + $0x98] sm:$0xff]  ;;  %v273_v42 = vld [vmem:[%s1867_s1 + $0xa0] sm:$0xff]  ;;  %v274_v43 = vld [vmem:[%s1867_s1 + $0xa8] sm:$0xff]  ;;  %v317_v44 = vsub.f32 %v221_v22, %v269_v37  ;;  %v318_v45 = vsub.f32 %v222_v23, %v270_v38  ;;  %v319_v46 = vsub.f32 %v223_v26, %v271_v39 }
   0xb   :  { %v739_v47 = vadd.f32 %v738_v36, %v692_v25  ;;  %v275_v48 = vld [vmem:[%s1867_s1 + $0xb0] sm:$0xff]  ;;  %v276_v49 = vld [vmem:[%s1867_s1 + $0xb8] sm:$0xff]  ;;  %v320_v50 = vsub.f32 %v224_v27, %v272_v41  ;;  %v321_v51 = vsub.f32 %v225_v28, %v273_v42  ;;  %v322_v52 = vsub.f32 %v226_v31, %v274_v43  ;;  %v205_v57 = vld [vmem:[%s1866_s0] sm:$0xff] }
   0xc   :  { %v365_v55 = vmul.f32 %v317_v44, %v317_v44  ;;  %v366_v56 = vmul.f32 %v318_v45, %v318_v45  ;;  %v206_v58 = vld [vmem:[%s1866_s0 + $0x8] sm:$0xff]  ;;  %v207_v59 = vld [vmem:[%s1866_s0 + $0x10] sm:$0xff]  ;;  %v323_v61 = vsub.f32 %v227_v32, %v275_v48  ;;  %v324_v62 = vsub.f32 %v228_v33, %v276_v49  ;;  %v208_v0 = vld [vmem:[%s1866_s0 + $0x18] sm:$0xff] }
   0xd   :  { %v740_v60 = vadd.f32 %v739_v47, %v693_v35  ;;  %v367_v63 = vmul.f32 %v319_v46, %v319_v46  ;;  %v209_v1 = vld [vmem:[%s1866_s0 + $0x20] sm:$0xff]  ;;  %v210_v2 = vld [vmem:[%s1866_s0 + $0x28] sm:$0xff]  ;;  %v368_v4 = vmul.f32 %v320_v50, %v320_v50  ;;  %v369_v5 = vmul.f32 %v321_v51, %v321_v51  ;;  %v211_v7 = vld [vmem:[%s1866_s0 + $0x30] sm:$0xff] }
   0xe   :  { %v415_v6 = vadd.f32 %v366_v56, %v365_v55  ;;  %v212_v8 = vld [vmem:[%s1866_s0 + $0x38] sm:$0xff]  ;;  %v253_v9 = vld [vmem:[%s1867_s1] sm:$0xff]  ;;  %v254_v10 = vld [vmem:[%s1867_s1 + $0x8] sm:$0xff]  ;;  %v370_v12 = vmul.f32 %v322_v52, %v322_v52  ;;  %v371_v26 = vmul.f32 %v323_v61, %v323_v61  ;;  %v372_v27 = vmul.f32 %v324_v62, %v324_v62 }
   0xf   :  { %v741_v11 = vadd.f32 %v740_v60, %v694_v40  ;;  %v255_v13 = vld [vmem:[%s1867_s1 + $0x10] sm:$0xff]  ;;  %v256_v14 = vld [vmem:[%s1867_s1 + $0x18] sm:$0xff]  ;;  %v257_v15 = vld [vmem:[%s1867_s1 + $0x20] sm:$0xff]  ;;  %v301_v16 = vsub.f32 %v205_v57, %v253_v9  ;;  %v302_v17 = vsub.f32 %v206_v58, %v254_v10 }
  0x10   :  { %v416_v18 = vadd.f32 %v415_v6, %v367_v63  ;;  %v258_v19 = vld [vmem:[%s1867_s1 + $0x28] sm:$0xff]  ;;  %v259_v20 = vld [vmem:[%s1867_s1 + $0x30] sm:$0xff]  ;;  %v260_v21 = vld [vmem:[%s1867_s1 + $0x38] sm:$0xff]  ;;  %v303_v22 = vsub.f32 %v207_v59, %v255_v13  ;;  %v304_v23 = vsub.f32 %v208_v0, %v256_v14  ;;  %v305_v24 = vsub.f32 %v209_v1, %v257_v15 }
  0x11   :  { %v742_v25 = vadd.f32 %v741_v11, %v695_v53  ;;  %v306_v28 = vsub.f32 %v210_v2, %v258_v19  ;;  %v554_v29 = vld [vmem:[%s1864_s2 + $0x40] sm:$0xff]  ;;  %v349_v31 = vmul.f32 %v301_v16, %v301_v16  ;;  %v350_v32 = vmul.f32 %v302_v17, %v302_v17  ;;  %v555_v34 = vld [vmem:[%s1864_s2 + $0x48] sm:$0xff]  ;;  %v556_v35 = vld [vmem:[%s1864_s2 + $0x50] sm:$0xff] }
  0x12   :  { %v417_v30 = vadd.f32 %v416_v18, %v368_v4  ;;  %v351_v33 = vmul.f32 %v303_v22, %v303_v22  ;;  %v557_v36 = vld [vmem:[%s1864_s2 + $0x58] sm:$0xff]  ;;  %v307_v38 = vsub.f32 %v211_v7, %v259_v20  ;;  %v308_v39 = vsub.f32 %v212_v8, %v260_v21  ;;  %v558_v41 = vld [vmem:[%s1864_s2 + $0x60] sm:$0xff]  ;;  %v559_v42 = vld [vmem:[%s1864_s2 + $0x68] sm:$0xff] }
  0x13   :  { %v743_v37 = vadd.f32 %v742_v25, %v696_v54  ;;  %v352_v40 = vmul.f32 %v304_v23, %v304_v23  ;;  %v602_v43 = vld [vmem:[%s1865_s3 + $0x40] sm:$0xff]  ;;  %v353_v45 = vmul.f32 %v305_v24, %v305_v24  ;;  %v354_v46 = vmul.f32 %v306_v28, %v306_v28  ;;  %v603_v48 = vld [vmem:[%s1865_s3 + $0x48] sm:$0xff]  ;;  %v604_v49 = vld [vmem:[%s1865_s3 + $0x50] sm:$0xff] }
  0x14   :  { %v418_v44 = vadd.f32 %v417_v30, %v369_v5  ;;  %v397_v47 = vadd.f32 %v350_v32, %v349_v31  ;;  %v605_v50 = vld [vmem:[%s1865_s3 + $0x58] sm:$0xff]  ;;  %v560_v52 = vld [vmem:[%s1864_s2 + $0x70] sm:$0xff]  ;;  %v606_v53 = vld [vmem:[%s1865_s3 + $0x60] sm:$0xff]  ;;  %v650_v55 = vsub.f32 %v554_v29, %v602_v43  ;;  %v651_v56 = vsub.f32 %v555_v34, %v603_v48 }
  0x15   :  { %v744_v51 = vadd.f32 %v743_v37, %v697_v3  ;;  %v607_v54 = vld [vmem:[%s1865_s3 + $0x68] sm:$0xff]  ;;  %v652_v57 = vsub.f32 %v556_v35, %v604_v49  ;;  %v561_v60 = vld [vmem:[%s1864_s2 + $0x78] sm:$0xff]  ;;  %v608_v61 = vld [vmem:[%s1865_s3 + $0x70] sm:$0xff]  ;;  %v653_v63 = vsub.f32 %v557_v36, %v605_v50  ;;  %v654_v0 = vsub.f32 %v558_v41, %v606_v53 }
  0x16   :  { %v419_v58 = vadd.f32 %v418_v44, %v370_v12  ;;  %v398_v59 = vadd.f32 %v397_v47, %v351_v33  ;;  %v609_v62 = vld [vmem:[%s1865_s3 + $0x78] sm:$0xff]  ;;  %v355_v1 = vmul.f32 %v307_v38, %v307_v38  ;;  %v1252_v2 = vmul.f32 %v308_v39, %v308_v39  ;;  %v562_v5 = vld [vmem:[%s1864_s2 + $0x80] sm:$0xff]  ;;  %v563_v6 = vld [vmem:[%s1864_s2 + $0x88] sm:$0xff] }
  0x17   :  { %745 = vadd.xlane.f32.xlu1 %v744_v51  ;;  %v655_v3 = vsub.f32 %v559_v42, %v607_v54  ;;  %v698_v4 = vmul.f32 %v650_v55, %v650_v55  ;;  %v564_v7 = vld [vmem:[%s1864_s2 + $0x90] sm:$0xff]  ;;  %v699_v10 = vmul.f32 %v651_v56, %v651_v56  ;;  %v700_v11 = vmul.f32 %v652_v57, %v652_v57  ;;  %v565_v12 = vld [vmem:[%s1864_s2 + $0x98] sm:$0xff]  ;;  %v566_v13 = vld [vmem:[%s1864_s2 + $0xa0] sm:$0xff] }
  0x18   :  { %v420_v8 = vadd.f32 %v419_v58, %v371_v26  ;;  %v399_v9 = vadd.f32 %v398_v59, %v352_v40  ;;  %v567_v14 = vld [vmem:[%s1864_s2 + $0xa8] sm:$0xff]  ;;  %v656_v15 = vsub.f32 %v560_v52, %v608_v61  ;;  %v657_v16 = vsub.f32 %v561_v60, %v609_v62  ;;  %v610_v19 = vld [vmem:[%s1865_s3 + $0x80] sm:$0xff]  ;;  %v612_v21 = vld [vmem:[%s1865_s3 + $0x90] sm:$0xff] }
  0x19   :  { %v701_v17 = vmul.f32 %v653_v63, %v653_v63  ;;  %v702_v18 = vmul.f32 %v654_v0, %v654_v0  ;;  %v611_v20 = vld [vmem:[%s1865_s3 + $0x88] sm:$0xff]  ;;  %v703_v24 = vmul.f32 %v655_v3, %v655_v3  ;;  %v747_v25 = vadd.f32 %v699_v10, %v698_v4  ;;  %v613_v26 = vld [vmem:[%s1865_s3 + $0x98] sm:$0xff]  ;;  %v614_v28 = vld [vmem:[%s1865_s3 + $0xa0] sm:$0xff] }
  0x1a   :  { %v421_v22 = vadd.f32 %v420_v8, %v372_v27  ;;  %v400_v23 = vadd.f32 %v399_v9, %v353_v45  ;;  %v615_v29 = vld [vmem:[%s1865_s3 + $0xa8] sm:$0xff]  ;;  %v568_v30 = vld [vmem:[%s1864_s2 + $0xb0] sm:$0xff]  ;;  %v569_v27 = vld [vmem:[%s1864_s2 + $0xb8] sm:$0xff]  ;;  %v658_v32 = vsub.f32 %v562_v5, %v610_v19  ;;  %v659_v33 = vsub.f32 %v563_v6, %v611_v20 }
  0x1b   :  { %v616_v31 = vld [vmem:[%s1865_s3 + $0xb0] sm:$0xff]  ;;  %v660_v34 = vsub.f32 %v564_v7, %v612_v21  ;;  %v661_v35 = vsub.f32 %v565_v12, %v613_v26  ;;  %v748_v37 = vadd.f32 %v747_v25, %v700_v11  ;;  %v617_v38 = vld [vmem:[%s1865_s3 + $0xb8] sm:$0xff]  ;;  %v662_v39 = vsub.f32 %v566_v13, %v614_v28  ;;  %v213_v41 = vld [vmem:[%s1866_s0 + $0x40] sm:$0xff] }
  0x1c   :  { %422 = vadd.xlane.f32.xlu2 %v421_v22  ;;  %v401_v36 = vadd.f32 %v400_v23, %v354_v46  ;;  %v663_v40 = vsub.f32 %v567_v14, %v615_v29  ;;  %v214_v42 = vld [vmem:[%s1866_s0 + $0x48] sm:$0xff]  ;;  %v704_v43 = vmul.f32 %v656_v15, %v656_v15  ;;  %v705_v44 = vmul.f32 %v657_v16, %v657_v16  ;;  %v215_v46 = vld [vmem:[%s1866_s0 + $0x50] sm:$0xff]  ;;  %v216_v48 = vld [vmem:[%s1866_s0 + $0x58] sm:$0xff] }
  0x1d   :  { %v706_v45 = vmul.f32 %v658_v32, %v658_v32  ;;  %v707_v47 = vmul.f32 %v659_v33, %v659_v33  ;;  %v217_v49 = vld [vmem:[%s1866_s0 + $0x60] sm:$0xff]  ;;  %v749_v51 = vadd.f32 %v748_v37, %v701_v17  ;;  %v664_v52 = vsub.f32 %v568_v30, %v616_v31  ;;  %v218_v54 = vld [vmem:[%s1866_s0 + $0x68] sm:$0xff]  ;;  %v263_v61 = vld [vmem:[%s1867_s1 + $0x50] sm:$0xff] }
  0x1e   :  { %v402_v50 = vadd.f32 %v401_v36, %v355_v1  ;;  %v708_v53 = vmul.f32 %v660_v34, %v660_v34  ;;  %v261_v55 = vld [vmem:[%s1867_s1 + $0x40] sm:$0xff]  ;;  %v262_v56 = vld [vmem:[%s1867_s1 + $0x48] sm:$0xff]  ;;  %v665_v57 = vsub.f32 %v569_v27, %v617_v38  ;;  %v709_v58 = vmul.f32 %v661_v35, %v661_v35  ;;  %v264_v62 = vld [vmem:[%s1867_s1 + $0x58] sm:$0xff] }
  0x1f   :  { %v710_v59 = vmul.f32 %v662_v39, %v662_v39  ;;  %v711_v60 = vmul.f32 %v663_v40, %v663_v40  ;;  %v265_v63 = vld [vmem:[%s1867_s1 + $0x60] sm:$0xff]  ;;  %v750_v1 = vadd.f32 %v749_v51, %v702_v18  ;;  %v756_v3 = vadd.f32 %v707_v47, %v706_v45  ;;  %v219_v4 = vld [vmem:[%s1866_s0 + $0x70] sm:$0xff]  ;;  %v266_v5 = vld [vmem:[%s1867_s1 + $0x68] sm:$0xff] }
  0x20   :  { %v403_v0 = vadd.f32 %v402_v50, %v1252_v2  ;;  %v309_v6 = vsub.f32 %v213_v41, %v261_v55  ;;  %v220_v7 = vld [vmem:[%s1866_s0 + $0x78] sm:$0xff]  ;;  %v267_v8 = vld [vmem:[%s1867_s1 + $0x70] sm:$0xff]  ;;  %v310_v9 = vsub.f32 %v214_v42, %v262_v56  ;;  %v311_v10 = vsub.f32 %v215_v46, %v263_v61  ;;  %v570_v17 = vld [vmem:[%s1864_s2 + $0xc0] sm:$0xff] }
  0x21   :  { %v268_v2 = vld [vmem:[%s1867_s1 + $0x78] sm:$0xff]  ;;  %v312_v11 = vsub.f32 %v216_v48, %v264_v62  ;;  %v313_v12 = vsub.f32 %v217_v49, %v265_v63  ;;  %v751_v13 = vadd.f32 %v750_v1, %v703_v24  ;;  %v712_v14 = vmul.f32 %v664_v52, %v664_v52  ;;  %v571_v18 = vld [vmem:[%s1864_s2 + $0xc8] sm:$0xff]  ;;  %v572_v19 = vld [vmem:[%s1864_s2 + $0xd0] sm:$0xff] }
  0x22   :  { %404 = vadd.xlane.f32.xlu0 %v403_v0  ;;  %v757_v15 = vadd.f32 %v756_v3, %v708_v53  ;;  %v314_v16 = vsub.f32 %v218_v54, %v266_v5  ;;  %v1360_v20 = vmul.f32 %v665_v57, %v665_v57  ;;  %v357_v21 = vmul.f32 %v309_v6, %v309_v6  ;;  %v573_v24 = vld [vmem:[%s1864_s2 + $0xd8] sm:$0xff]  ;;  %v574_v25 = vld [vmem:[%s1864_s2 + $0xe0] sm:$0xff]  ;;  %v619_v31 = vld [vmem:[%s1865_s3 + $0xc8] sm:$0xff] }
  0x23   :  { %v358_v22 = vmul.f32 %v310_v9, %v310_v9  ;;  %v359_v23 = vmul.f32 %v311_v10, %v311_v10  ;;  %v618_v26 = vld [vmem:[%s1865_s3 + $0xc0] sm:$0xff]  ;;  %v752_v28 = vadd.f32 %v751_v13, %v704_v43  ;;  %v315_v30 = vsub.f32 %v219_v4, %v267_v8  ;;  %v620_v32 = vld [vmem:[%s1865_s3 + $0xd0] sm:$0xff]  ;;  %v621_v33 = vld [vmem:[%s1865_s3 + $0xd8] sm:$0xff] }
  0x24   :  { %v758_v29 = vadd.f32 %v757_v15, %v709_v58  ;;  %v316_v27 = vsub.f32 %v220_v7, %v268_v2  ;;  %v360_v34 = vmul.f32 %v312_v11, %v312_v11  ;;  %v361_v35 = vmul.f32 %v313_v12, %v313_v12  ;;  %v575_v38 = vld [vmem:[%s1864_s2 + $0xe8] sm:$0xff]  ;;  %v622_v39 = vld [vmem:[%s1865_s3 + $0xe0] sm:$0xff]  ;;  %v576_v43 = vld [vmem:[%s1864_s2 + $0xf0] sm:$0xff] }
  0x25   :  { %v362_v36 = vmul.f32 %v314_v16, %v314_v16  ;;  %v406_v37 = vadd.f32 %v358_v22, %v357_v21  ;;  %v623_v40 = vld [vmem:[%s1865_s3 + $0xe8] sm:$0xff]  ;;  %v753_v41 = vadd.f32 %v752_v28, %v705_v44  ;;  %v577_v45 = vld [vmem:[%s1864_s2 + $0xf8] sm:$0xff]  ;;  %v666_v47 = vsub.f32 %v570_v17, %v618_v26  ;;  %v624_v49 = vld [vmem:[%s1865_s3 + $0xf0] sm:$0xff] }
  0x26   :  { %v759_v42 = vadd.f32 %v758_v29, %v710_v59  ;;  %v667_v46 = vsub.f32 %v571_v18, %v619_v31  ;;  %v625_v44 = vld [vmem:[%s1865_s3 + $0xf8] sm:$0xff]  ;;  %v668_v50 = vsub.f32 %v572_v19, %v620_v32  ;;  %v669_v51 = vsub.f32 %v573_v24, %v621_v33  ;;  %v237_v53 = vld [vmem:[%s1866_s0 + $0x100] sm:$0xff]  ;;  %v238_v58 = vld [vmem:[%s1866_s0 + $0x108] sm:$0xff] }
  0x27   :  { %v407_v48 = vadd.f32 %v406_v37, %v359_v23  ;;  %v670_v52 = vsub.f32 %v574_v25, %v622_v39  ;;  %754 = vadd.xlane.f32.xlu1 %v753_v41  ;;  %v363_v55 = vmul.f32 %v315_v30, %v315_v30  ;;  %v364_v56 = vmul.f32 %v316_v27, %v316_v27  ;;  %v239_v59 = vld [vmem:[%s1866_s0 + $0x110] sm:$0xff]  ;;  %v240_v61 = vld [vmem:[%s1866_s0 + $0x118] sm:$0xff]  ;;  %v286_v3 = vld [vmem:[%s1867_s1 + $0x108] sm:$0xff] }
  0x28   :  { %v760_v54 = vadd.f32 %v759_v42, %v711_v60  ;;  %v671_v57 = vsub.f32 %v575_v38, %v623_v40  ;;  %v714_v63 = vmul.f32 %v666_v47, %v666_v47  ;;  %v715_v0 = vmul.f32 %v667_v46, %v667_v46  ;;  %v285_v60 = vld [vmem:[%s1867_s1 + $0x100] sm:$0xff]  ;;  %v287_v4 = vld [vmem:[%s1867_s1 + $0x110] sm:$0xff]  ;;  %v288_v9 = vld [vmem:[%s1867_s1 + $0x118] sm:$0xff] }
  0x29   :  { %v408_v62 = vadd.f32 %v407_v48, %v360_v34  ;;  %v716_v1 = vmul.f32 %v668_v50, %v668_v50  ;;  %v672_v6 = vsub.f32 %v576_v43, %v624_v49  ;;  %v673_v7 = vsub.f32 %v577_v45, %v625_v44  ;;  %v241_v2 = vld [vmem:[%s1866_s0 + $0x120] sm:$0xff]  ;;  %v243_v16 = vld [vmem:[%s1866_s0 + $0x130] sm:$0xff]  ;;  %v290_v17 = vld [vmem:[%s1867_s1 + $0x128] sm:$0xff] }
  0x2a   :  { %v761_v5 = vadd.f32 %v760_v54, %v712_v14  ;;  %v717_v8 = vmul.f32 %v669_v51, %v669_v51  ;;  %v289_v10 = vld [vmem:[%s1867_s1 + $0x120] sm:$0xff]  ;;  %v718_v12 = vmul.f32 %v670_v52, %v670_v52  ;;  %v719_v13 = vmul.f32 %v671_v57, %v671_v57  ;;  %v242_v14 = vld [vmem:[%s1866_s0 + $0x128] sm:$0xff]  ;;  %v244_v19 = vld [vmem:[%s1866_s0 + $0x138] sm:$0xff] }
  0x2b   :  { %v409_v11 = vadd.f32 %v408_v62, %v361_v35  ;;  %v765_v15 = vadd.f32 %v715_v0, %v714_v63  ;;  %v291_v21 = vld [vmem:[%s1867_s1 + $0x130] sm:$0xff]  ;;  %v292_v22 = vld [vmem:[%s1867_s1 + $0x138] sm:$0xff]  ;;  %v333_v23 = vsub.f32 %v237_v53, %v285_v60  ;;  %v334_v24 = vsub.f32 %v238_v58, %v286_v3  ;;  %v230_v27 = vld [vmem:[%s1866_s0 + $0xc8] sm:$0xff] }
  0x2c   :  { %v762_v18 = vadd.f32 %v761_v5, %v1360_v20  ;;  %v335_v25 = vsub.f32 %v239_v59, %v287_v4  ;;  %v336_v29 = vsub.f32 %v240_v61, %v288_v9  ;;  %v337_v30 = vsub.f32 %v241_v2, %v289_v10  ;;  %v229_v20 = vld [vmem:[%s1866_s0 + $0xc0] sm:$0xff]  ;;  %v231_v31 = vld [vmem:[%s1866_s0 + $0xd0] sm:$0xff]  ;;  %v278_v43 = vld [vmem:[%s1867_s1 + $0xc8] sm:$0xff] }
  0x2d   :  { %v410_v26 = vadd.f32 %v409_v11, %v362_v36  ;;  %v766_v28 = vadd.f32 %v765_v15, %v716_v1  ;;  %v720_v32 = vmul.f32 %v672_v6, %v672_v6  ;;  %v721_v33 = vmul.f32 %v673_v7, %v673_v7  ;;  %v232_v36 = vld [vmem:[%s1866_s0 + $0xd8] sm:$0xff]  ;;  %v233_v37 = vld [vmem:[%s1866_s0 + $0xe0] sm:$0xff]  ;;  %v279_v45 = vld [vmem:[%s1867_s1 + $0xd0] sm:$0xff] }
  0x2e   :  { %763 = vadd.xlane.f32.xlu2 %v762_v18  ;;  %v338_v34 = vsub.f32 %v242_v14, %v290_v17  ;;  %v381_v35 = vmul.f32 %v333_v23, %v333_v23  ;;  %v277_v38 = vld [vmem:[%s1867_s1 + $0xc0] sm:$0xff]  ;;  %v382_v41 = vmul.f32 %v334_v24, %v334_v24  ;;  %v383_v42 = vmul.f32 %v335_v25, %v335_v25  ;;  %v280_v47 = vld [vmem:[%s1867_s1 + $0xd8] sm:$0xff]  ;;  %v234_v50 = vld [vmem:[%s1866_s0 + $0xe8] sm:$0xff] }
  0x2f   :  { %v411_v39 = vadd.f32 %v410_v26, %v363_v55  ;;  %v767_v40 = vadd.f32 %v766_v28, %v717_v8  ;;  %v339_v46 = vsub.f32 %v243_v16, %v291_v21  ;;  %v340_v48 = vsub.f32 %v244_v19, %v292_v22  ;;  %v281_v51 = vld [vmem:[%s1867_s1 + $0xe0] sm:$0xff]  ;;  %v282_v52 = vld [vmem:[%s1867_s1 + $0xe8] sm:$0xff]  ;;  %v235_v58 = vld [vmem:[%s1866_s0 + $0xf0] sm:$0xff] }
  0x30   :  { %v384_v49 = vmul.f32 %v336_v29, %v336_v29  ;;  %v385_v44 = vmul.f32 %v337_v30, %v337_v30  ;;  %v386_v55 = vmul.f32 %v338_v34, %v338_v34  ;;  %v433_v57 = vadd.f32 %v382_v41, %v381_v35  ;;  %v236_v59 = vld [vmem:[%s1866_s0 + $0xf8] sm:$0xff]  ;;  %v283_v61 = vld [vmem:[%s1867_s1 + $0xf0] sm:$0xff]  ;;  %v245_v60 = vld [vmem:[%s1866_s0 + $0x140] sm:$0xff] }
  0x31   :  { %v412_v53 = vadd.f32 %v411_v39, %v364_v56  ;;  %v768_v54 = vadd.f32 %v767_v40, %v718_v12  ;;  %v284_v62 = vld [vmem:[%s1867_s1 + $0xf8] sm:$0xff]  ;;  %v325_v56 = vsub.f32 %v229_v20, %v277_v38  ;;  %v326_v63 = vsub.f32 %v230_v27, %v278_v43  ;;  %v246_v7 = vld [vmem:[%s1866_s0 + $0x148] sm:$0xff]  ;;  %v247_v8 = vld [vmem:[%s1866_s0 + $0x150] sm:$0xff] }
  0x32   :  { %v327_v0 = vsub.f32 %v231_v31, %v279_v45  ;;  %v328_v1 = vsub.f32 %v232_v36, %v280_v47  ;;  %v434_v4 = vadd.f32 %v433_v57, %v383_v42  ;;  %v329_v5 = vsub.f32 %v233_v37, %v281_v51  ;;  %v248_v2 = vld [vmem:[%s1866_s0 + $0x158] sm:$0xff]  ;;  %v293_v15 = vld [vmem:[%s1867_s1 + $0x140] sm:$0xff]  ;;  %v294_v14 = vld [vmem:[%s1867_s1 + $0x148] sm:$0xff] }
  0x33   :  { %413 = vadd.xlane.f32.xlu0 %v412_v53  ;;  %v769_v3 = vadd.f32 %v768_v54, %v719_v13  ;;  %v330_v6 = vsub.f32 %v234_v50, %v282_v52  ;;  %v387_v9 = vmul.f32 %v339_v46, %v339_v46  ;;  %v1510_v10 = vmul.f32 %v340_v48, %v340_v48  ;;  %v249_v13 = vld [vmem:[%s1866_s0 + $0x160] sm:$0xff]  ;;  %v295_v21 = vld [vmem:[%s1867_s1 + $0x150] sm:$0xff]  ;;  %v296_v22 = vld [vmem:[%s1867_s1 + $0x158] sm:$0xff] }
  0x34   :  { %v373_v11 = vmul.f32 %v325_v56, %v325_v56  ;;  %v374_v12 = vmul.f32 %v326_v63, %v326_v63  ;;  %v435_v17 = vadd.f32 %v434_v4, %v384_v49  ;;  %v331_v18 = vsub.f32 %v235_v58, %v283_v61  ;;  %v297_v23 = vld [vmem:[%s1867_s1 + $0x160] sm:$0xff]  ;;  %v250_v29 = vld [vmem:[%s1866_s0 + $0x168] sm:$0xff]  ;;  %v252_v34 = vld [vmem:[%s1866_s0 + $0x178] sm:$0xff] }
  0x35   :  { %v770_v16 = vadd.f32 %v769_v3, %v720_v32  ;;  %v375_v19 = vmul.f32 %v327_v0, %v327_v0  ;;  %v332_v24 = vsub.f32 %v236_v59, %v284_v62  ;;  %v376_v25 = vmul.f32 %v328_v1, %v328_v1  ;;  %v298_v30 = vld [vmem:[%s1867_s1 + $0x168] sm:$0xff]  ;;  %v251_v32 = vld [vmem:[%s1866_s0 + $0x170] sm:$0xff]  ;;  %v300_v37 = vld [vmem:[%s1867_s1 + $0x178] sm:$0xff] }
  0x36   :  { %v377_v26 = vmul.f32 %v329_v5, %v329_v5  ;;  %v378_v28 = vmul.f32 %v330_v6, %v330_v6  ;;  %v436_v27 = vadd.f32 %v435_v17, %v385_v44  ;;  %v424_v31 = vadd.f32 %v374_v12, %v373_v11  ;;  %v299_v35 = vld [vmem:[%s1867_s1 + $0x170] sm:$0xff]  ;;  %v586_v41 = vld [vmem:[%s1864_s2 + $0x140] sm:$0xff]  ;;  %v587_v42 = vld [vmem:[%s1864_s2 + $0x148] sm:$0xff] }
  0x37   :  { %v771_v20 = vadd.f32 %v770_v16, %v721_v33  ;;  %v341_v36 = vsub.f32 %v245_v60, %v293_v15  ;;  %v342_v33 = vsub.f32 %v246_v7, %v294_v14  ;;  %v343_v38 = vsub.f32 %v247_v8, %v295_v21  ;;  %v588_v48 = vld [vmem:[%s1864_s2 + $0x150] sm:$0xff]  ;;  %v589_v49 = vld [vmem:[%s1864_s2 + $0x158] sm:$0xff]  ;;  %v590_v44 = vld [vmem:[%s1864_s2 + $0x160] sm:$0xff] }
  0x38   :  { %v344_v39 = vsub.f32 %v248_v2, %v296_v22  ;;  %v345_v40 = vsub.f32 %v249_v13, %v297_v23  ;;  %v437_v43 = vadd.f32 %v436_v27, %v386_v55  ;;  %v379_v45 = vmul.f32 %v331_v18, %v331_v18  ;;  %v591_v54 = vld [vmem:[%s1864_s2 + $0x168] sm:$0xff]  ;;  %v592_v55 = vld [vmem:[%s1864_s2 + $0x170] sm:$0xff]  ;;  %v593_v57 = vld [vmem:[%s1864_s2 + $0x178] sm:$0xff] }
  0x39   :  { %772 = vadd.xlane.f32.xlu1 %v771_v20  ;;  %v425_v47 = vadd.f32 %v424_v31, %v375_v19  ;;  %v346_v46 = vsub.f32 %v250_v29, %v298_v30  ;;  %v1563_v50 = vmul.f32 %v332_v24, %v332_v24  ;;  %v389_v51 = vmul.f32 %v341_v36, %v341_v36  ;;  %v634_v58 = vld [vmem:[%s1865_s3 + $0x140] sm:$0xff]  ;;  %v635_v59 = vld [vmem:[%s1865_s3 + $0x148] sm:$0xff]  ;;  %v636_v0 = vld [vmem:[%s1865_s3 + $0x150] sm:$0xff] }
  0x3a   :  { %v390_v52 = vmul.f32 %v342_v33, %v342_v33  ;;  %v391_v53 = vmul.f32 %v343_v38, %v343_v38  ;;  %v438_v61 = vadd.f32 %v437_v43, %v387_v9  ;;  %v347_v56 = vsub.f32 %v251_v32, %v299_v35  ;;  %v637_v1 = vld [vmem:[%s1865_s3 + $0x158] sm:$0xff]  ;;  %v638_v60 = vld [vmem:[%s1865_s3 + $0x160] sm:$0xff]  ;;  %v639_v7 = vld [vmem:[%s1865_s3 + $0x168] sm:$0xff] }
  0x3b   :  { %v426_v62 = vadd.f32 %v425_v47, %v376_v25  ;;  %v348_v63 = vsub.f32 %v252_v34, %v300_v37  ;;  %v392_v3 = vmul.f32 %v344_v39, %v344_v39  ;;  %v393_v4 = vmul.f32 %v345_v40, %v345_v40  ;;  %v640_v8 = vld [vmem:[%s1865_s3 + $0x170] sm:$0xff]  ;;  %v641_v2 = vld [vmem:[%s1865_s3 + $0x178] sm:$0xff]  ;;  %v578_v18 = vld [vmem:[%s1864_s2 + $0x100] sm:$0xff] }
  0x3c   :  { %v394_v5 = vmul.f32 %v346_v46, %v346_v46  ;;  %v442_v6 = vadd.f32 %v390_v52, %v389_v51  ;;  %v439_v9 = vadd.f32 %v438_v61, %v1510_v10  ;;  %v682_v12 = vsub.f32 %v586_v41, %v634_v58  ;;  %v579_v19 = vld [vmem:[%s1864_s2 + $0x108] sm:$0xff]  ;;  %v580_v24 = vld [vmem:[%s1864_s2 + $0x110] sm:$0xff]  ;;  %v581_v25 = vld [vmem:[%s1864_s2 + $0x118] sm:$0xff] }
  0x3d   :  { %v427_v11 = vadd.f32 %v426_v62, %v377_v26  ;;  %v683_v13 = vsub.f32 %v587_v42, %v635_v59  ;;  %v684_v14 = vsub.f32 %v588_v48, %v636_v0  ;;  %v685_v16 = vsub.f32 %v589_v49, %v637_v1  ;;  %v582_v26 = vld [vmem:[%s1864_s2 + $0x120] sm:$0xff]  ;;  %v584_v31 = vld [vmem:[%s1864_s2 + $0x130] sm:$0xff]  ;;  %v627_v34 = vld [vmem:[%s1865_s3 + $0x108] sm:$0xff] }
  0x3e   :  { %v443_v15 = vadd.f32 %v442_v6, %v391_v53  ;;  %v686_v17 = vsub.f32 %v590_v44, %v638_v60  ;;  %440 = vadd.xlane.f32.xlu2 %v439_v9  ;;  %v687_v22 = vsub.f32 %v591_v54, %v639_v7  ;;  %v688_v23 = vsub.f32 %v592_v55, %v640_v8  ;;  %v626_v32 = vld [vmem:[%s1865_s3 + $0x100] sm:$0xff]  ;;  %v628_v35 = vld [vmem:[%s1865_s3 + $0x110] sm:$0xff]  ;;  %v585_v39 = vld [vmem:[%s1864_s2 + $0x138] sm:$0xff] }
  0x3f   :  { %v428_v21 = vadd.f32 %v427_v11, %v378_v28  ;;  %v689_v10 = vsub.f32 %v593_v57, %v641_v2  ;;  %v730_v30 = vmul.f32 %v682_v12, %v682_v12  ;;  %v731_v20 = vmul.f32 %v683_v13, %v683_v13  ;;  %v583_v28 = vld [vmem:[%s1864_s2 + $0x128] sm:$0xff]  ;;  %v629_v40 = vld [vmem:[%s1865_s3 + $0x118] sm:$0xff]  ;;  %v630_v41 = vld [vmem:[%s1865_s3 + $0x120] sm:$0xff] }
  0x40   :  { %v444_v29 = vadd.f32 %v443_v15, %v392_v3  ;;  %v732_v27 = vmul.f32 %v684_v14, %v684_v14  ;;  %v395_v37 = vmul.f32 %v347_v56, %v347_v56  ;;  %v396_v33 = vmul.f32 %v348_v63, %v348_v63  ;;  %v632_v48 = vld [vmem:[%s1865_s3 + $0x130] sm:$0xff]  ;;  %v633_v49 = vld [vmem:[%s1865_s3 + $0x138] sm:$0xff] }
  0x41   :  { %v429_v36 = vadd.f32 %v428_v21, %v379_v45  ;;  %v733_v38 = vmul.f32 %v685_v16, %v685_v16  ;;  %v734_v43 = vmul.f32 %v686_v17, %v686_v17  ;;  %v735_v47 = vmul.f32 %v687_v22, %v687_v22  ;;  %v631_v45 = vld [vmem:[%s1865_s3 + $0x128] sm:$0xff] }
  0x42   :  { %v445_v42 = vadd.f32 %v444_v29, %v393_v4  ;;  %v783_v46 = vadd.f32 %v731_v20, %v730_v30  ;;  %v674_v51 = vsub.f32 %v578_v18, %v626_v32  ;;  %v675_v52 = vsub.f32 %v579_v19, %v627_v34 }
  0x43   :  { %v430_v44 = vadd.f32 %v429_v36, %v1563_v50  ;;  %v676_v53 = vsub.f32 %v580_v24, %v628_v35  ;;  %v677_v57 = vsub.f32 %v581_v25, %v629_v40  ;;  %v678_v58 = vsub.f32 %v582_v26, %v630_v41 }
  0x44   :  { %v446_v54 = vadd.f32 %v445_v42, %v394_v5  ;;  %v784_v55 = vadd.f32 %v783_v46, %v732_v27  ;;  %v679_v59 = vsub.f32 %v583_v28, %v631_v45  ;;  %v680_v61 = vsub.f32 %v584_v31, %v632_v48  ;;  %v1686_v46 = vld [vmem:[%s1868_s5] sm:$0xff]  ;;  %v1691_v45 = vld [vmem:[%s1868_s5 + $0x8] sm:$0xff]  ;;  %v1696_v48 = vld [vmem:[%s1868_s5 + $0x10] sm:$0xff] }
  0x45   :  { %431 = vadd.xlane.f32.xlu0 %v430_v44  ;;  %v681_v62 = vsub.f32 %v585_v39, %v633_v49  ;;  %v722_v56 = vmul.f32 %v674_v51, %v674_v51  ;;  %v723_v1 = vmul.f32 %v675_v52, %v675_v52  ;;  %v724_v60 = vmul.f32 %v676_v53, %v676_v53  ;;  %v1704_v53 = vld [vmem:[%s1868_s5 + $0x18] sm:$0xff] }
  0x46   :  { %v447_v63 = vadd.f32 %v446_v54, %v395_v37  ;;  %v785_v0 = vadd.f32 %v784_v55, %v733_v38  ;;  %v736_v3 = vmul.f32 %v688_v23, %v688_v23  ;;  %v725_v50 = vmul.f32 %v677_v57, %v677_v57  ;;  %v887_v54 = vld [vmem:[%s1869_s4] sm:$0xff]  ;;  %v888_v55 = vld [vmem:[%s1869_s4 + $0x8] sm:$0xff] }
  0x47   :  { %v774_v7 = vadd.f32 %v723_v1, %v722_v56  ;;  %v737_v8 = vmul.f32 %v689_v10, %v689_v10  ;;  %v726_v2 = vmul.f32 %v678_v58, %v678_v58  ;;  %v727_v12 = vmul.f32 %v679_v59, %v679_v59  ;;  %v889_v58 = vld [vmem:[%s1869_s4 + $0x10] sm:$0xff]  ;;  %v890_v59 = vld [vmem:[%s1869_s4 + $0x18] sm:$0xff] }
  0x48   :  { %v448_v4 = vadd.f32 %v447_v63, %v396_v33  ;;  %v786_v6 = vadd.f32 %v785_v0, %v734_v43  ;;  %v728_v14 = vmul.f32 %v680_v61, %v680_v61  ;;  %v729_v17 = vmul.f32 %v681_v62, %v681_v62 }
  0x49   :  { %v775_v9 = vadd.f32 %v774_v7, %v724_v60  ;;  %v891_v61 = vsub.f32 %v887_v54, %v1686_v46  ;;  %v892_v62 = vsub.f32 %v888_v55, %v1691_v45  ;;  %v893_v0 = vsub.f32 %v889_v58, %v1696_v48 }
  0x4a   :  { %449 = vadd.xlane.f32.xlu1 %v448_v4  ;;  %v787_v5 = vadd.f32 %v786_v6, %v735_v47  ;;  %v894_v1 = vsub.f32 %v890_v59, %v1704_v53 }
  0x4b   :  { %v776_v13 = vadd.f32 %v775_v9, %v725_v50  ;;  %v896_v4 = vand.u32 2147483647, %v892_v62  ;;  %v897_v7 = vand.u32 2147483647, %v893_v0 }
  0x4c   :  { %v788_v11 = vadd.f32 %v787_v5, %v736_v3  ;;  %v895_v3 = vand.u32 2147483647, %v891_v61 }
  0x4d   :  { %v777_v16 = vadd.f32 %v776_v13, %v726_v2  ;;  %v898_v2 = vand.u32 2147483647, %v894_v1 }
  0x4e   :  { %v789_v15 = vadd.f32 %v788_v11, %v737_v8  ;;  %v899_v9 = vadd.f32 %v896_v4, %v895_v3 }
  0x4f   :  { %v778_v18 = vadd.f32 %v777_v16, %v727_v12 }
  0x50   :  { %790 = vadd.xlane.f32.xlu2 %v789_v15  ;;  %v900_v16 = vadd.f32 %v899_v9, %v897_v7  ;;  %v915_v9 = vld [vmem:[%s1870_s6 + $0x8] sm:$0xff] }
  0x51   :  { %v779_v19 = vadd.f32 %v778_v18, %v728_v14 }
  0x53   :  { %v780_v21 = vadd.f32 %v779_v19, %v729_v17 }
  0x55   :  { %781 = vadd.xlane.f32.xlu0 %v780_v21 }
  0x8a   :  { %v1648_v22 = vpop.xlane.xlu1 %745 }
  0x8b   :  { %v802_v17 = vand.u32 2147483648, %v1648_v22  ;;  %vm799_vm1 = vcmp.eq.f32.partialorder %v1648_v22, inf  ;;  %vm801_vm13 = vcmp.eq.f32.partialorder %v1648_v22, 0.0 }
  0x8f   :  { %v1650_v23 = vpop.xlane.xlu2 %422 }
  0x90   :  { %996 = vrsqrt.f32 %v1650_v23  ;;  %vm482_vm2 = vcmp.eq.f32.partialorder %v1650_v23, inf  ;;  %vm484_vm6 = vcmp.eq.f32.partialorder %v1650_v23, 0.0 }
  0x95   :  { %v1652_v10 = vpop.xlane.xlu0 %404 }
  0x96   :  { %998 = vrsqrt.f32 %v1652_v10  ;;  %v997_v25 = vpop.eup %996  ;;  %vm458_vm0 = vcmp.eq.f32.partialorder %v1652_v10, inf  ;;  %vm460_vm4 = vcmp.eq.f32.partialorder %v1652_v10, 0.0 }
  0x97   :  { %v476_v29 = vmul.f32 %v997_v25, %v1650_v23 }
  0x99   :  { %v477_v32 = vmul.f32 %v997_v25, %v476_v29  ;;  %v901_v29 = vadd.f32 %v900_v16, %v898_v2 }
  0x9a   :  { %v1656_v24 = vpop.xlane.xlu1 %754 }
  0x9b   :  { %1000 = vrsqrt.f32 %v1656_v24  ;;  %v478_v33 = vmul.f32 0.5, %v477_v32  ;;  %902 = vadd.xlane.f32.xlu2 %v901_v29  ;;  %vm811_vm7 = vcmp.eq.f32.partialorder %v1656_v24, inf  ;;  %vm813_vm9 = vcmp.eq.f32.partialorder %v1656_v24, 0.0 }
  0x9c   :  { %v999_v26 = vpop.eup %998  ;;  %1002 = vrsqrt.f32 %v1648_v22 }
  0x9d   :  { %v452_v30 = vmul.f32 %v999_v26, %v1652_v10  ;;  %v479_v49 = vsub.f32 1.5, %v478_v33  ;;  %v485_v33 = vand.u32 2147483648, %v1650_v23 }
  0x9f   :  { %v453_v34 = vmul.f32 %v999_v26, %v452_v30  ;;  %v480_v6 = vmul.f32 %v997_v25, %v479_v49 }
  0xa1   :  { %v1664_v27 = vpop.xlane.xlu2 %763  ;;  %v1667_v28 = vpop.eup %1000  ;;  %v454_v38 = vmul.f32 0.5, %v453_v34  ;;  %v481_v18 = vmul.f32 %v480_v6, %v1650_v23 }
  0xa2   :  { %v1669_v31 = vpop.eup %1002  ;;  %v805_v35 = vmul.f32 %v1667_v28, %v1656_v24 }
  0xa3   :  { %v793_v37 = vmul.f32 %v1669_v31, %v1648_v22  ;;  %v455_v44 = vsub.f32 1.5, %v454_v38 }
  0xa4   :  { %v806_v42 = vmul.f32 %v1667_v28, %v805_v35 }
  0xa5   :  { %v794_v47 = vmul.f32 %v1669_v31, %v793_v37  ;;  %v456_v50 = vmul.f32 %v999_v26, %v455_v44 }
  0xa6   :  { %v1662_v20 = vpop.xlane.xlu0 %413  ;;  %v807_v56 = vmul.f32 0.5, %v806_v42 }
  0xa7   :  { %1004 = vrsqrt.f32 %v1662_v20  ;;  %v795_v60 = vmul.f32 0.5, %v794_v47  ;;  %v457_v21 = vmul.f32 %v456_v50, %v1652_v10  ;;  %vm470_vm3 = vcmp.eq.f32.partialorder %v1662_v20, inf }
  0xa8   :  { %1006 = vrsqrt.f32 %v1664_v27  ;;  %v808_v12 = vsub.f32 1.5, %v807_v56  ;;  %v473_v42 = vand.u32 2147483648, %v1662_v20  ;;  %vm472_vm5 = vcmp.eq.f32.partialorder %v1662_v20, 0.0 }
  0xa9   :  { %v796_v14 = vsub.f32 1.5, %v795_v60 }
  0xaa   :  { %v809_v30 = vmul.f32 %v1667_v28, %v808_v12  ;;  %v483_v28 = vsel %vm482_vm2, %v1650_v23, %v481_v18  ;;  %v814_v23 = vand.u32 2147483648, %v1656_v24  ;;  %vm825_vm2 = vcmp.eq.f32.partialorder %v1664_v27, 0.0 }
  0xab   :  { %v797_v35 = vmul.f32 %v1669_v31, %v796_v14  ;;  %v486_v59 = vsel %vm484_vm6, %v485_v33, %v483_v28 }
  0xac   :  { %v1677_v40 = vpop.xlane.xlu1 %772  ;;  %v810_v49 = vmul.f32 %v809_v30, %v1656_v24  ;;  %v527_v6 = vsel %vm523_vm8, %v486_v59, 0.0  ;;  %v919_v30 = vsub.f32 %v915_v9, %v1691_v45 }
  0xad   :  { %v1005_v36 = vpop.eup %1004  ;;  %1008 = vrsqrt.f32 %v1677_v40  ;;  %v798_v55 = vmul.f32 %v797_v35, %v1648_v22 }
  0xae   :  { %v464_v39 = vmul.f32 %v1005_v36, %v1662_v20  ;;  %v1679_v41 = vpop.eup %1006 }
  0xaf   :  { %v817_v57 = vmul.f32 %v1679_v41, %v1664_v27  ;;  %v1777_v50 = vsel %vm799_vm1, %v1648_v22, %v798_v55  ;;  %vm823_vm1 = vcmp.eq.f32.partialorder %v1664_v27, inf }
  0xb0   :  { %v465_v43 = vmul.f32 %v1005_v36, %v464_v39 }
  0xb1   :  { %v1699_v52 = vpop.xlane.xlu2 %440  ;;  %v818_v8 = vmul.f32 %v1679_v41, %v817_v57 }
  0xb2   :  { %v466_v51 = vmul.f32 0.5, %v465_v43  ;;  %1010 = vrsqrt.f32 %v1699_v52  ;;  %v459_v43 = vsel %vm458_vm0, %v1652_v10, %v457_v21  ;;  %vm506_vm10 = vcmp.eq.f32.partialorder %v1699_v52, inf }
  0xb3   :  { %v1726_v11 = vpop.eup %1008  ;;  %v819_v25 = vmul.f32 0.5, %v818_v8  ;;  %vm508_vm12 = vcmp.eq.f32.partialorder %v1699_v52, 0.0  ;;  %v509_v18 = vand.u32 2147483648, %v1699_v52 }
  0xb4   :  { %v467_v63 = vsub.f32 1.5, %v466_v51  ;;  %v829_v32 = vmul.f32 %v1726_v11, %v1677_v40 }
  0xb5   :  { %v820_v31 = vsub.f32 1.5, %v819_v25 }
  0xb6   :  { %v468_v5 = vmul.f32 %v1005_v36, %v467_v63  ;;  %v461_v36 = vand.u32 2147483648, %v1652_v10  ;;  %v830_v44 = vmul.f32 %v1726_v11, %v829_v32  ;;  %v812_v10 = vsel %vm811_vm7, %v1656_v24, %v810_v49  ;;  %v914_v24 = vld [vmem:[%s1870_s6] sm:$0xff] }
  0xb7   :  { %v821_v61 = vmul.f32 %v1679_v41, %v820_v31  ;;  %v1783_v2 = vsel %vm813_vm9, %v814_v23, %v812_v10  ;;  %v918_v29 = vsub.f32 %v914_v24, %v1686_v46  ;;  %v917_v31 = vld [vmem:[%s1870_s6 + $0x18] sm:$0xff] }
  0xb8   :  { %v1728_v13 = vpop.xlane.xlu0 %431  ;;  %v1011_v15 = vpop.eup %1010  ;;  %v469_v26 = vmul.f32 %v468_v5, %v1662_v20  ;;  %v462_v56 = vsel %vm460_vm4, %v461_v36, %v459_v43  ;;  %v831_v1 = vmul.f32 0.5, %v830_v44  ;;  %v923_v44 = vand.u32 2147483647, %v919_v30 }
  0xb9   :  { %1012 = vrsqrt.f32 %v1728_v13  ;;  %v500_v19 = vmul.f32 %v1011_v15, %v1699_v52  ;;  %v524_v4 = vsel %vm523_vm8, %v462_v56, 0.0  ;;  %v1780_v7 = vmul.f32 %v821_v61, %v1664_v27 }
  0xba   :  { %v471_v47 = vsel %vm470_vm3, %v1662_v20, %v469_v26  ;;  %v832_v14 = vsub.f32 1.5, %v831_v1  ;;  %vm494_vm11 = vcmp.eq.f32.partialorder %v1728_v13, inf  ;;  %v916_v26 = vld [vmem:[%s1870_s6 + $0x10] sm:$0xff]  ;;  %vm496_vm14 = vcmp.eq.f32.partialorder %v1728_v13, 0.0 }
  0xbb   :  { %v501_v34 = vmul.f32 %v1011_v15, %v500_v19  ;;  %v474_v58 = vsel %vm472_vm5, %v473_v42, %v471_v47  ;;  %v920_v42 = vsub.f32 %v916_v26, %v1696_v48  ;;  %v922_v49 = vand.u32 2147483647, %v918_v29 }
  0xbc   :  { %v525_v3 = vsel %vm523_vm8, %v474_v58, 0.0  ;;  %v833_v46 = vmul.f32 %v1726_v11, %v832_v14  ;;  %vm835_vm3 = vcmp.eq.f32.partialorder %v1677_v40, inf  ;;  %vm837_vm4 = vcmp.eq.f32.partialorder %v1677_v40, 0.0 }
  0xbd   :  { %v1743_v37 = vpop.xlane.xlu1 %449  ;;  %v502_v38 = vmul.f32 0.5, %v501_v34  ;;  %v497_v34 = vand.u32 2147483648, %v1728_v13  ;;  %v926_v1 = vadd.f32 %v923_v44, %v922_v49 }
  0xbe   :  { %1014 = vrsqrt.f32 %v1743_v37  ;;  %vm518_vm15 = vcmp.eq.f32.partialorder %v1743_v37, inf  ;;  %vm520_vm0 = vcmp.eq.f32.partialorder %v1743_v37, 0.0  ;;  %v521_v55 = vand.u32 2147483648, %v1743_v37 }
  0xbf   :  { %v1013_v39 = vpop.eup %1012  ;;  %v503_v54 = vsub.f32 1.5, %v502_v38  ;;  %v834_v48 = vmul.f32 %v833_v46, %v1677_v40 }
  0xc0   :  { %v488_v51 = vmul.f32 %v1013_v39, %v1728_v13 }
  0xc1   :  { %v504_v63 = vmul.f32 %v1011_v15, %v503_v54  ;;  %v526_v15 = vadd.f32 %v525_v3, %v524_v4  ;;  %v836_v3 = vsel %vm835_vm3, %v1677_v40, %v834_v48  ;;  %v865_v4 = vsel %vm523_vm8, %v1783_v2, 0.0 }
  0xc2   :  { %v489_v57 = vmul.f32 %v1013_v39, %v488_v51 }
  0xc3   :  { %v1764_v62 = vpop.xlane.xlu2 %790  ;;  %v505_v8 = vmul.f32 %v504_v63, %v1699_v52  ;;  %v528_v28 = vadd.f32 %v527_v6, %v526_v15  ;;  %v826_v6 = vand.u32 2147483648, %v1664_v27 }
  0xc4   :  { %v1015_v0 = vpop.eup %1014  ;;  %v490_v60 = vmul.f32 0.5, %v489_v57  ;;  %1016 = vrsqrt.f32 %v1764_v62  ;;  %vm859_vm5 = vcmp.eq.f32.partialorder %v1764_v62, inf  ;;  %vm861_vm9 = vcmp.eq.f32.partialorder %v1764_v62, 0.0 }
  0xc5   :  { %v512_v20 = vmul.f32 %v1015_v0, %v1743_v37  ;;  %v507_v35 = vsel %vm506_vm10, %v1699_v52, %v505_v8  ;;  %v921_v52 = vsub.f32 %v917_v31, %v1704_v53  ;;  %v803_v53 = vsel %vm801_vm13, %v802_v17, %v1777_v50 }
  0xc6   :  { %v491_v41 = vsub.f32 1.5, %v490_v60  ;;  %v510_v43 = vsel %vm508_vm12, %v509_v18, %v507_v35  ;;  %v838_v8 = vand.u32 2147483648, %v1677_v40 }
  0xc7   :  { %v513_v5 = vmul.f32 %v1015_v0, %v512_v20  ;;  %v531_v59 = vsel %vm523_vm8, %v510_v43, 0.0  ;;  %v925_v22 = vand.u32 2147483647, %v921_v52 }
  0xc8   :  { %v492_v12 = vmul.f32 %v1013_v39, %v491_v41  ;;  %v1792_v16 = vpop.xlane.xlu0 %781  ;;  %v839_v9 = vsel %vm837_vm4, %v838_v8, %v836_v3 }
  0xc9   :  { %v514_v19 = vmul.f32 0.5, %v513_v5  ;;  %1018 = vrsqrt.f32 %v1792_v16  ;;  %v869_v40 = vsel %vm523_vm8, %v839_v9, 0.0  ;;  %vm847_vm6 = vcmp.eq.f32.partialorder %v1792_v16, inf }
  0xca   :  { %v1017_v21 = vpop.eup %1016  ;;  %v493_v25 = vmul.f32 %v492_v12, %v1728_v13  ;;  %vm849_vm7 = vcmp.eq.f32.partialorder %v1792_v16, 0.0 }
  0xcb   :  { %v853_v32 = vmul.f32 %v1017_v21, %v1764_v62  ;;  %v515_v36 = vsub.f32 1.5, %v514_v19  ;;  %v850_v19 = vand.u32 2147483648, %v1792_v16 }
  0xcc   :  { %v495_v33 = vsel %vm494_vm11, %v1728_v13, %v493_v25 }
  0xcd   :  { %v498_v38 = vsel %vm496_vm14, %v497_v34, %v495_v33  ;;  %v516_v45 = vmul.f32 %v1015_v0, %v515_v36  ;;  %v854_v39 = vmul.f32 %v1017_v21, %v853_v32  ;;  %v924_v0 = vand.u32 2147483647, %v920_v42 }
  0xce   :  { %v529_v47 = vsel %vm523_vm8, %v498_v38, 0.0 }
  0xcf   :  { %v517_v13 = vmul.f32 %v516_v45, %v1743_v37  ;;  %v530_v11 = vadd.f32 %v529_v47, %v528_v28  ;;  %v855_v51 = vmul.f32 0.5, %v854_v39  ;;  %v1019_v54 = vpop.eup %1018  ;;  %v927_v17 = vadd.f32 %v926_v1, %v924_v0 }
  0xd0   :  { %v841_v57 = vmul.f32 %v1019_v54, %v1792_v16 }
  0xd1   :  { %v519_v58 = vsel %vm518_vm15, %v1743_v37, %v517_v13  ;;  %v856_v61 = vsub.f32 1.5, %v855_v51  ;;  %v532_v63 = vadd.f32 %v531_v59, %v530_v11  ;;  %v824_v37 = vsel %vm823_vm1, %v1664_v27, %v1780_v7 }
  0xd2   :  { %v522_v56 = vsel %vm520_vm0, %v521_v55, %v519_v58  ;;  %v842_v10 = vmul.f32 %v1019_v54, %v841_v57  ;;  %v864_v7 = vsel %vm523_vm8, %v803_v53, 0.0  ;;  %v827_v24 = vsel %vm825_vm2, %v826_v6, %v824_v37 }
  0xd3   :  { %v533_v60 = vsel %vm523_vm8, %v522_v56, 0.0  ;;  %v857_v23 = vmul.f32 %v1017_v21, %v856_v61  ;;  %v866_v12 = vadd.f32 %v865_v4, %v864_v7  ;;  %v928_v2 = vadd.f32 %v927_v17, %v925_v22 }
  0xd4   :  { %v534_v20 = vadd.f32 %v533_v60, %v532_v63  ;;  %v843_v41 = vmul.f32 0.5, %v842_v10  ;;  %v867_v18 = vsel %vm523_vm8, %v827_v24, 0.0  ;;  %v862_v21 = vand.u32 2147483648, %v1764_v62 }
  0xd5   :  { %v858_v5 = vmul.f32 %v857_v23, %v1764_v62  ;;  %v868_v25 = vadd.f32 %v867_v18, %v866_v12 }
  0xd6   :  { %535 = vadd.xlane.f32.xlu0 %v534_v20  ;;  %v844_v50 = vsub.f32 1.5, %v843_v41 }
  0xd7   :  { %v860_v14 = vsel %vm859_vm5, %v1764_v62, %v858_v5  ;;  %v870_v32 = vadd.f32 %v869_v40, %v868_v25 }
  0xd8   :  { %v845_v15 = vmul.f32 %v1019_v54, %v844_v50  ;;  %v863_v30 = vsel %vm861_vm9, %v862_v21, %v860_v14 }
  0xd9   :  { %v873_v36 = vsel %vm523_vm8, %v863_v30, 0.0 }
  0xda   :  { %v846_v27 = vmul.f32 %v845_v15, %v1792_v16 }
  0xdc   :  { %v848_v26 = vsel %vm847_vm6, %v1792_v16, %v846_v27 }
  0xdd   :  { %v851_v29 = vsel %vm849_vm7, %v850_v19, %v848_v26 }
  0xde   :  { %929 = vadd.xlane.f32.xlu0 %v928_v2  ;;  %v871_v34 = vsel %vm523_vm8, %v851_v29, 0.0 }
  0xdf   :  { %v872_v35 = vadd.f32 %v871_v34, %v870_v32 }
  0xe1   :  { %v874_v33 = vadd.f32 %v873_v36, %v872_v35 }
  0xe3   :  { %875 = vadd.xlane.f32.xlu1 %v874_v33 }
 0x10e   :  { %v903_v38 = vpop.xlane.xlu2 %902 }
 0x10f   :  { %v904_v31 = vrot.slane %v903_v38, 4 }
 0x111   :  { %v905_v47 = vadd.f32 %v904_v31, %v903_v38 }
 0x113   :  { %v906_v11 = vrot.slane %v905_v47, 2 }
 0x115   :  { %v907_v52 = vadd.f32 %v906_v11, %v905_v47 }
 0x117   :  { %v908_v61 = vrot.slane %v907_v52, 1 }
 0x119   :  { %v909_v1 = vadd.f32 %v908_v61, %v907_v52 }
 0x149   :  { %v536_v28 = vpop.xlane.xlu0 %535 }
 0x14a   :  { %v537_v46 = vrot.slane %v536_v28, 4 }
 0x14c   :  { %v538_v45 = vadd.f32 %v537_v46, %v536_v28 }
 0x14e   :  { %v539_v39 = vrot.slane %v538_v45, 2 }
 0x150   :  { %v540_v16 = vadd.f32 %v539_v39, %v538_v45 }
 0x151   :  { %v930_v42 = vpop.xlane.xlu0 %929 }
 0x152   :  { %v931_v62 = vrot.slane %v930_v42, 4  ;;  %v541_v43 = vrot.slane %v540_v16, 1 }
 0x154   :  { %v932_v49 = vadd.f32 %v931_v62, %v930_v42  ;;  %v542_v44 = vadd.f32 %v541_v43, %v540_v16 }
 0x156   :  { %v933_v13 = vrot.slane %v932_v49, 2  ;;  %988 = vpush %v542_v44  ;;  %v876_v51 = vpop.xlane.xlu1 %875 }
 0x157   :  { %v877_v54 = vrot.slane %v876_v51, 4 }
 0x158   :  { %v934_v48 = vadd.f32 %v933_v13, %v932_v49 }
 0x159   :  { %v878_v55 = vadd.f32 %v877_v54, %v876_v51 }
 0x15a   :  { %v935_v59 = vrot.slane %v934_v48, 1 }
 0x15b   :  { %v879_v57 = vrot.slane %v878_v55, 2 }
 0x15c   :  { %v936_v0 = vadd.f32 %v935_v59, %v934_v48 }
 0x15d   :  { %v880_v58 = vadd.f32 %v879_v57, %v878_v55 }
 0x15f   :  { %v881_v56 = vrot.slane %v880_v58, 1 }
 0x161   :  { %v882_v63 = vadd.f32 %v881_v56, %v880_v58 }
 0x163   :  { %990 = vpush %v882_v63 }
 0x164   :  { %992 = vpush %v909_v1 }
 0x165   :  { %994 = vpush %v936_v0 }
 0x187   :  { %s989_s6 = spop %988 }
 0x188   :  { %v544_v60 = vstv %s989_s6 }
 0x189   :  { %v545_v23 = vmul.f32 0.020833334, %v544_v60 }
 0x194   :  { %s991_s29 = spop %990 }
 0x195   :  { %v884_v10 = vstv %s991_s29  ;;  %s993_s30 = spop %992 }
 0x196   :  { %v885_v20 = vmul.f32 0.010416667, %v884_v10  ;;  %v911_v53 = vstv %s993_s30  ;;  %s995_s8 = spop %994 }
 0x197   :  { %v938_v37 = vstv %s995_s8  ;;  %v912_v41 = vmul.f32 0.015625, %v911_v53 }
 0x198   :  { %v886_v3 = vadd.f32 %v885_v20, %v545_v23  ;;  %v939_v4 = vmul.f32 0.0078125, %v938_v37 }
 0x19a   :  { %v913_v6 = vadd.f32 %v912_v41, %v886_v3 }
 0x19c   :  { %v940_v8 = vadd.f32 %v939_v4, %v913_v6 }
 0x19e   :  { %941 = vst [vmem:[%s1871_s7] sm:$0xff] %v940_v8 }

</bundles_post_ra>
